<compile_context>
chip_gen: v7x
topology: tpu7x:2x2x1
jax: 0.10.0
libtpu: 0.0.40
codegen_flags: <defaults>
</compile_context>

<pallas_src>
import functools

import jax
import jax.numpy as jnp
from jax.experimental import pallas as pl
from jax.experimental.pallas import tpu as pltpu

LEAKY_SLOPE = 0.2
BN_EPS = 0.001
LANE = 128
SUBLANE = 8


def _round_up(n, m):
    return ((n + m - 1) // m) * m


def _cdiv(a, b):
    return -(-a // b)


def _vmem_capacity():
    try:
        info = pltpu.get_tpu_info()
        cap = getattr(info, "vmem_capacity_bytes", None)
        if cap:
            return int(cap)
    except Exception:
        pass
    return 128 << 20  # v5e/v6e default; v7x reports 64 MiB via get_tpu_info


def _footprint(tb, tn, hp, lat_p, cond_p, cbytes, obytes):
    """Conservative VMEM footprint estimate (bytes) for one grid step."""
    const = (lat_p * hp + cond_p * 2 * hp + hp * hp) * cbytes + 2 * hp * 4
    stream = 2 * (hp * tn * cbytes + tn * 4)            # w3 slab + b3, 2 buffers
    io = 2 * tb * (lat_p + cond_p) * cbytes + 2 * tb * tn * obytes
    scratch = tb * hp * cbytes
    # assume worst case: constant-index weights end up double-buffered anyway
    return 2 * const + stream + io + scratch


# ---------------------------------------------------------------------------
# Kernel: grid = (batch_tile i, output_tile j).
#   j == 0 : compute layers 1-2 (BN folded, dropout = identity), cache h.
#   all j  : h @ w3_slab + b3_slab  ->  lane-dense (tb, TN) output store.
# ---------------------------------------------------------------------------
def _decoder_kernel(x_ref, c_ref, w1x_ref, wcc_ref, w2h_ref, w3_ref,
                    b12_ref, b3_ref, out_ref, h_ref, *, hp):
    @pl.when(pl.program_id(1) == 0)
    def _():
        cdt = w2h_ref.dtype
        # merged tiny-K condition matmul: c @ [W1c | W2c]  ->  (tb, 2*hp)
        cc = jnp.dot(c_ref[...], wcc_ref[...], preferred_element_type=jnp.float32)
        # layer 1 (BN folded into W1/b1)
        h = (jnp.dot(x_ref[...], w1x_ref[...], preferred_element_type=jnp.float32)
             + cc[:, :hp] + b12_ref[0:1, :])
        h = jnp.where(h > 0, h, LEAKY_SLOPE * h)
        # layer 2 (BN folded into W2/b2)
        h = (jnp.dot(h.astype(cdt), w2h_ref[...], preferred_element_type=jnp.float32)
             + cc[:, hp:] + b12_ref[1:2, :])
        h = jnp.where(h > 0, h, LEAKY_SLOPE * h)
        h_ref[...] = h.astype(h_ref.dtype)

    # output layer: streamed (hp, TN) weight slab, lane-dense store.
    out_ref[...] = (
        jnp.dot(h_ref[...], w3_ref[...], preferred_element_type=jnp.float32)
        + b3_ref[...]
    ).astype(out_ref.dtype)


# ---------------------------------------------------------------------------
# Parameter prep (run ONCE at parameter-load time, not per forward call):
# fold eval-mode BatchNorm, split/merge weights, pad to lane/sublane multiples,
# pick the output-tile width TN, cast weights to the compute dtype.
# ---------------------------------------------------------------------------
def prepare_params(p, compute_dtype=jnp.bfloat16, tn_target=1024, batch_tile=512):
    kin, hidden = p["w1"].shape          # (latent+cond, hidden)
    cond = p["w2"].shape[0] - hidden
    latent = kin - cond
    out_dim = p["w3"].shape[1]

    hp = _round_up(hidden, LANE)
    lat_p = _round_up(latent, SUBLANE)
    cond_p = _round_up(cond, SUBLANE)

    # Fold BN (shared BatchNorm1d, running stats / eval mode):
    #   bn(z) = (z - rmean) * scale + beta, scale = gamma / sqrt(rvar + eps)
    scale = p["gamma"] / jnp.sqrt(p["rvar"] + BN_EPS)
    w1 = p["w1"] * scale[None, :]
    b1 = (p["b1"] - p["rmean"]) * scale + p["beta"]
    w2 = p["w2"] * scale[None, :]
    b2 = (p["b2"] - p["rmean"]) * scale + p["beta"]

    def pad2(w, rows, cols):
        return jnp.pad(w, ((0, rows - w.shape[0]), (0, cols - w.shape[1])))

    w1x = pad2(w1[:latent, :], lat_p, hp)
    w1c = pad2(w1[latent:, :], cond_p, hp)
    w2h = pad2(w2[:hidden, :], hp, hp)
    w2c = pad2(w2[hidden:, :], cond_p, hp)
    wcc = jnp.concatenate([w1c, w2c], axis=1)          # (cond_p, 2*hp)

    # Output-tile width TN (lane-dense, fits VMEM budget even at tb=batch_tile).
    cbytes = jnp.dtype(compute_dtype).itemsize
    budget = int(0.6 * _vmem_capacity())
    n_j = max(1, _cdiv(_round_up(out_dim, LANE), tn_target))
    while True:
        tn = _round_up(_cdiv(out_dim, n_j), LANE)
        if tn == LANE or _footprint(batch_tile, tn, hp, lat_p, cond_p, cbytes, 4) <= budget:
            break
        n_j *= 2
    n_j = _cdiv(_round_up(out_dim, LANE), tn)
    op_pad = n_j * tn

    w3 = pad2(p["w3"], hp, op_pad)
    b12 = jnp.stack([jnp.pad(b1, (0, hp - hidden)),
                     jnp.pad(b2, (0, hp - hidden))], axis=0).astype(jnp.float32)
    b3 = jnp.pad(p["b3"], (0, op_pad - out_dim)).astype(jnp.float32)[None, :]

    return dict(
        w1x=w1x.astype(compute_dtype), wcc=wcc.astype(compute_dtype),
        w2h=w2h.astype(compute_dtype), w3=w3.astype(compute_dtype),
        b12=b12, b3=b3, log_theta=p["log_theta"],
        hp=hp, lat_p=lat_p, cond_p=cond_p, latent=latent, cond=cond,
        out_dim=out_dim, tn=tn, n_j=n_j, op_pad=op_pad,
        compute_dtype=compute_dtype, budget=budget,
    )


# ---------------------------------------------------------------------------
# Forward wrapper
# ---------------------------------------------------------------------------
def decoder_forward(x, c, prep, *, batch_tile=512, out_dtype=jnp.float32):
    B = x.shape[0]
    hp, lat_p, cond_p = prep["hp"], prep["lat_p"], prep["cond_p"]
    latent, cond, out_dim = prep["latent"], prep["cond"], prep["out_dim"]
    tn, n_j, op_pad = prep["tn"], prep["n_j"], prep["op_pad"]
    cdt = prep["compute_dtype"]
    cbytes = jnp.dtype(cdt).itemsize
    obytes = jnp.dtype(out_dtype).itemsize

    # Batch tile: >= 2 tiles whenever B >= 16 so v7x's two TensorCores both work.
    if B < 16:
        tb = _round_up(B, SUBLANE)
    else:
        tb = min(batch_tile, _round_up(_cdiv(B, 2), SUBLANE))
    budget = prep["budget"]
    while _footprint(tb, tn, hp, lat_p, cond_p, cbytes, obytes) > budget and tb > SUBLANE:
        tb = max(SUBLANE, _round_up(tb // 2, SUBLANE))
    bp = _cdiv(B, tb) * tb

    fp = _footprint(tb, tn, hp, lat_p, cond_p, cbytes, obytes)
    vmem_limit = int(min(max(int(1.5 * fp) + (2 << 20), 32 << 20),
                         int(0.75 * _vmem_capacity())))

    x_p = jnp.pad(x.astype(cdt), ((0, bp - B), (0, lat_p - latent)))
    c_p = jnp.pad(c.astype(cdt), ((0, bp - B), (0, cond_p - cond)))

    kernel = functools.partial(_decoder_kernel, hp=hp)

    def run(single_buffer_weights):
        const_kw = ({"pipeline_mode": pl.Buffered(1)}
                    if single_buffer_weights else {})
        return pl.pallas_call(
            kernel,
            out_shape=jax.ShapeDtypeStruct((bp, op_pad), out_dtype),
            grid=(bp // tb, n_j),
            in_specs=[
                pl.BlockSpec((tb, lat_p), lambda i, j: (i, 0)),            # x
                pl.BlockSpec((tb, cond_p), lambda i, j: (i, 0)),           # c
                pl.BlockSpec((lat_p, hp), lambda i, j: (0, 0), **const_kw),   # W1x
                pl.BlockSpec((cond_p, 2 * hp), lambda i, j: (0, 0), **const_kw),  # [W1c|W2c]
                pl.BlockSpec((hp, hp), lambda i, j: (0, 0), **const_kw),      # W2h
                pl.BlockSpec((hp, tn), lambda i, j: (0, j)),               # W3 slab
                pl.BlockSpec((2, hp), lambda i, j: (0, 0), **const_kw),       # b1,b2
                pl.BlockSpec((1, tn), lambda i, j: (0, j)),                # b3 slab
            ],
            out_specs=pl.BlockSpec((tb, tn), lambda i, j: (i, j)),
            scratch_shapes=[pltpu.VMEM((tb, hp), cdt)],                    # cached h
            compiler_params=pltpu.CompilerParams(
                dimension_semantics=("parallel", "arbitrary"),
                vmem_limit_bytes=vmem_limit,
            ),
        )(x_p, c_p, prep["w1x"], prep["wcc"], prep["w2h"], prep["w3"],
          prep["b12"], prep["b3"])

    try:
        out = run(True)
    except Exception:
        # older jax without BlockSpec pipeline_mode / Buffered(1) support
        out = run(False)

    log_x_hat = out[:B, :out_dim].astype(jnp.float32)
    # log_theta.expand(B, -1): data-independent -> broadcast outside the kernel.
    log_theta = jnp.broadcast_to(prep["log_theta"][None, :], (B, out_dim))
    return log_x_hat, log_theta


# ---------------------------------------------------------------------------
# Synthetic parameters (shapes match the torch module) and a pure-JAX reference
# ---------------------------------------------------------------------------
def init_params(key, output_dim, condition_dim, hidden_dim, latent_dim):
    ks = jax.random.split(key, 10)

    def lin(k, fan_in, fan_out):
        bound = 1.0 / jnp.sqrt(fan_in)
        return jax.random.uniform(k, (fan_in, fan_out), jnp.float32,
                                  minval=-bound, maxval=bound)

    return {
        "w1": lin(ks[0], latent_dim + condition_dim, hidden_dim),
        "w2": lin(ks[1], hidden_dim + condition_dim, hidden_dim),
        "w3": lin(ks[2], hidden_dim, output_dim),
        "b1": jax.random.uniform(ks[3], (hidden_dim,), jnp.float32, -0.1, 0.1),
        "b2": jax.random.uniform(ks[4], (hidden_dim,), jnp.float32, -0.1, 0.1),
        "b3": jax.random.uniform(ks[5], (output_dim,), jnp.float32, -0.1, 0.1),
        # non-trivial BatchNorm1d state so the BN fold is actually exercised
        "gamma": jax.random.uniform(ks[6], (hidden_dim,), jnp.float32, 0.5, 1.5),
        "beta": jax.random.uniform(ks[7], (hidden_dim,), jnp.float32, -0.1, 0.1),
        "rmean": jax.random.uniform(ks[8], (hidden_dim,), jnp.float32, -0.5, 0.5),
        "rvar": jax.random.uniform(ks[9], (hidden_dim,), jnp.float32, 0.5, 1.5),
        # log_theta = nn.Parameter(torch.zeros(output_dim))
        "log_theta": jnp.zeros((output_dim,), jnp.float32),
    }


def reference_forward(x, c, p):
    """Pure-JAX reference (eval mode: running-stats BN, identity dropout)."""
    scale = p["gamma"] / jnp.sqrt(p["rvar"] + BN_EPS)
    hi = jax.lax.Precision.HIGHEST

    def bn_act(h):
        h = (h - p["rmean"]) * scale + p["beta"]
        return jnp.where(h > 0, h, LEAKY_SLOPE * h)

    h = bn_act(jnp.dot(jnp.concatenate([x, c], axis=1), p["w1"], precision=hi) + p["b1"])
    h = bn_act(jnp.dot(jnp.concatenate([h, c], axis=1), p["w2"], precision=hi) + p["b2"])
    log_x_hat = jnp.dot(h, p["w3"], precision=hi) + p["b3"]
    log_theta = jnp.broadcast_to(p["log_theta"][None, :], log_x_hat.shape)
    return log_x_hat, log_theta


if __name__ == "__main__":
    key = jax.random.PRNGKey(0)

    # --- config 1: tiny shapes, single batch / output tile -------------------
    batch, latent_dim, condition_dim, hidden_dim, output_dim = 8, 16, 8, 32, 64
    kx, kc, kp, kx2, kc2, kp2 = jax.random.split(key, 6)
    x = jax.random.normal(kx, (batch, latent_dim), jnp.float32)
    c = jax.random.normal(kc, (batch, condition_dim), jnp.float32)
    params = init_params(kp, output_dim, condition_dim, hidden_dim, latent_dim)

    ref_x_hat, ref_theta = reference_forward(x, c, params)

    # f32 matmul path
    prep_f32 = prepare_params(params, compute_dtype=jnp.float32)
    log_x_hat, log_theta = decoder_forward(x, c, prep_f32)
    jax.block_until_ready((log_x_hat, log_theta))
    assert log_x_hat.shape == (batch, output_dim)
    assert log_theta.shape == (batch, output_dim)
    assert jnp.allclose(log_x_hat, ref_x_hat, atol=1e-3, rtol=1e-3)
    assert jnp.allclose(log_theta, ref_theta)

    # bf16 matmul path (default; v5e/v6e/v7x MXU-native, f32 accumulation)
    prep_bf16 = prepare_params(params)
    log_x_hat_bf16, _ = decoder_forward(x, c, prep_bf16)
    jax.block_until_ready(log_x_hat_bf16)
    assert jnp.allclose(log_x_hat_bf16, ref_x_hat, atol=1.5e-1, rtol=1.5e-1)

    # --- config 2: multiple batch tiles + multiple streamed output tiles -----
    batch2, output_dim2 = 40, 300
    x2 = jax.random.normal(kx2, (batch2, latent_dim), jnp.float32)
    c2 = jax.random.normal(kc2, (batch2, condition_dim), jnp.float32)
    params2 = init_params(kp2, output_dim2, condition_dim, hidden_dim, latent_dim)
    ref2_x_hat, ref2_theta = reference_forward(x2, c2, params2)

    # tn_target=128 forces 3 output tiles; batch=40 gives 2 batch tiles.
    prep2 = prepare_params(params2, compute_dtype=jnp.float32, tn_target=128)
    out2_x_hat, out2_theta = decoder_forward(x2, c2, prep2)
    jax.block_until_ready((out2_x_hat, out2_theta))
    assert out2_x_hat.shape == (batch2, output_dim2)
    assert jnp.allclose(out2_x_hat, ref2_x_hat, atol=1e-3, rtol=1e-3)
    assert jnp.allclose(out2_theta, ref2_theta)

    print("KERNEL_OK")
</pallas_src>

<mosaic_0001>
module attributes {stable_mosaic.version = 11 : i64} {
  func.func @_decoder_kernel(%arg0: i32, %arg1: i32, %arg2: memref<8x16xf32, #tpu.memory_space<vmem>>, %arg3: memref<8x8xf32, #tpu.memory_space<vmem>>, %arg4: memref<16x128xf32, #tpu.memory_space<vmem>>, %arg5: memref<8x256xf32, #tpu.memory_space<vmem>>, %arg6: memref<128x128xf32, #tpu.memory_space<vmem>>, %arg7: memref<128x128xf32, #tpu.memory_space<vmem>>, %arg8: memref<2x128xf32, #tpu.memory_space<vmem>>, %arg9: memref<1x128xf32, #tpu.memory_space<vmem>>, %arg10: memref<8x128xf32, #tpu.memory_space<vmem>>, %arg11: memref<8x128xf32, #tpu.memory_space<vmem>>) attributes {dimension_semantics = [#tpu.dimension_semantics<parallel>, #tpu.dimension_semantics<arbitrary>], iteration_bounds = array<i64: 1, 1>, scalar_prefetch = 0 : i64, scratch_operands = 1 : i64, tpu.core_type = #tpu.core_type<tc>, window_params = [{transform_indices = @transform_0, window_bounds = array<i64: 8, 16>}, {transform_indices = @transform_1, window_bounds = array<i64: 8, 8>}, {pipeline_mode = #tpu.pipeline_mode<synchronous>, transform_indices = @transform_2, window_bounds = array<i64: 16, 128>}, {pipeline_mode = #tpu.pipeline_mode<synchronous>, transform_indices = @transform_3, window_bounds = array<i64: 8, 256>}, {pipeline_mode = #tpu.pipeline_mode<synchronous>, transform_indices = @transform_4, window_bounds = array<i64: 128, 128>}, {transform_indices = @transform_5, window_bounds = array<i64: 128, 128>}, {pipeline_mode = #tpu.pipeline_mode<synchronous>, transform_indices = @transform_6, window_bounds = array<i64: 2, 128>}, {transform_indices = @transform_7, window_bounds = array<i64: 1, 128>}, {transform_indices = @transform_8, window_bounds = array<i64: 8, 128>}]} {
    %c0_i32 = arith.constant 0 : i32
    %0 = arith.cmpi eq, %arg1, %c0_i32 : i32
    %1 = arith.extui %0 : i1 to i32
    %c0_i32_0 = arith.constant 0 : i32
    %2 = arith.cmpi ne, %1, %c0_i32_0 : i32
    scf.if %2 {
      %c0_8 = arith.constant 0 : index
      %c0_9 = arith.constant 0 : index
      %10 = vector.load %arg3[%c0_8, %c0_9] : memref<8x8xf32, #tpu.memory_space<vmem>>, vector<8x8xf32>
      %c0_10 = arith.constant 0 : index
      %c0_11 = arith.constant 0 : index
      %11 = vector.load %arg5[%c0_10, %c0_11] : memref<8x256xf32, #tpu.memory_space<vmem>>, vector<8x256xf32>
      %cst_12 = arith.constant dense<0.000000e+00> : vector<8x256xf32>
      %12 = tpu.matmul %10, %11, %cst_12 {dimension_numbers = #tpu.dot_dimension_numbers<[1], [0], [0], [1], [0, 0, 1, 1], [], []>} : vector<8x8xf32>, vector<8x256xf32>, vector<8x256xf32> -> vector<8x256xf32>
      %c0_13 = arith.constant 0 : index
      %c0_14 = arith.constant 0 : index
      %13 = vector.load %arg2[%c0_13, %c0_14] : memref<8x16xf32, #tpu.memory_space<vmem>>, vector<8x16xf32>
      %c0_15 = arith.constant 0 : index
      %c0_16 = arith.constant 0 : index
      %14 = vector.load %arg4[%c0_15, %c0_16] : memref<16x128xf32, #tpu.memory_space<vmem>>, vector<16x128xf32>
      %cst_17 = arith.constant dense<0.000000e+00> : vector<8x128xf32>
      %15 = tpu.matmul %13, %14, %cst_17 {dimension_numbers = #tpu.dot_dimension_numbers<[1], [0], [0], [1], [0, 0, 1, 1], [], []>} : vector<8x16xf32>, vector<16x128xf32>, vector<8x128xf32> -> vector<8x128xf32>
      %16 = vector.extract_strided_slice %12 {offsets = [0, 0], sizes = [8, 128], strides = [1, 1]} : vector<8x256xf32> to vector<8x128xf32>
      %17 = arith.addf %15, %16 : vector<8x128xf32>
      %c0_18 = arith.constant 0 : index
      %c0_19 = arith.constant 0 : index
      %18 = vector.load %arg8[%c0_18, %c0_19] : memref<2x128xf32, #tpu.memory_space<vmem>>, vector<1x128xf32>
      %19 = vector.broadcast %18 : vector<1x128xf32> to vector<8x128xf32>
      %20 = arith.addf %17, %19 : vector<8x128xf32>
      %cst_20 = arith.constant 0.000000e+00 : f32
      %21 = vector.broadcast %cst_20 : f32 to vector<8x128xf32>
      %22 = arith.cmpf ogt, %20, %21 : vector<8x128xf32>
      %cst_21 = arith.constant 2.000000e-01 : f32
      %23 = vector.broadcast %cst_21 : f32 to vector<8x128xf32>
      %24 = arith.mulf %23, %20 : vector<8x128xf32>
      %25 = arith.select %22, %20, %24 : vector<8x128xi1>, vector<8x128xf32>
      %c0_22 = arith.constant 0 : index
      %c0_23 = arith.constant 0 : index
      %26 = vector.load %arg6[%c0_22, %c0_23] : memref<128x128xf32, #tpu.memory_space<vmem>>, vector<128x128xf32>
      %cst_24 = arith.constant dense<0.000000e+00> : vector<8x128xf32>
      %27 = tpu.matmul %25, %26, %cst_24 {dimension_numbers = #tpu.dot_dimension_numbers<[1], [0], [0], [1], [0, 0, 1, 1], [], []>} : vector<8x128xf32>, vector<128x128xf32>, vector<8x128xf32> -> vector<8x128xf32>
      %28 = vector.extract_strided_slice %12 {offsets = [0, 128], sizes = [8, 128], strides = [1, 1]} : vector<8x256xf32> to vector<8x128xf32>
      %29 = arith.addf %27, %28 : vector<8x128xf32>
      %c1 = arith.constant 1 : index
      %c0_25 = arith.constant 0 : index
      %30 = vector.load %arg8[%c1, %c0_25] : memref<2x128xf32, #tpu.memory_space<vmem>>, vector<1x128xf32>
      %31 = vector.broadcast %30 : vector<1x128xf32> to vector<8x128xf32>
      %32 = arith.addf %29, %31 : vector<8x128xf32>
      %cst_26 = arith.constant 0.000000e+00 : f32
      %33 = vector.broadcast %cst_26 : f32 to vector<8x128xf32>
      %34 = arith.cmpf ogt, %32, %33 : vector<8x128xf32>
      %cst_27 = arith.constant 2.000000e-01 : f32
      %35 = vector.broadcast %cst_27 : f32 to vector<8x128xf32>
      %36 = arith.mulf %35, %32 : vector<8x128xf32>
      %37 = arith.select %34, %32, %36 : vector<8x128xi1>, vector<8x128xf32>
      %c0_28 = arith.constant 0 : index
      %c0_29 = arith.constant 0 : index
      %38 = vector.load %arg11[%c0_28, %c0_29] : memref<8x128xf32, #tpu.memory_space<vmem>>, vector<8x128xf32>
      tpu.vector_store %arg11[%c0_28, %c0_29], %37 {strides = array<i32>} : memref<8x128xf32, #tpu.memory_space<vmem>>, vector<8x128xf32>,
    } else {
    }
    %c0 = arith.constant 0 : index
    %c0_1 = arith.constant 0 : index
    %3 = vector.load %arg11[%c0, %c0_1] : memref<8x128xf32, #tpu.memory_space<vmem>>, vector<8x128xf32>
    %c0_2 = arith.constant 0 : index
    %c0_3 = arith.constant 0 : index
    %4 = vector.load %arg7[%c0_2, %c0_3] : memref<128x128xf32, #tpu.memory_space<vmem>>, vector<128x128xf32>
    %cst = arith.constant dense<0.000000e+00> : vector<8x128xf32>
    %5 = tpu.matmul %3, %4, %cst {dimension_numbers = #tpu.dot_dimension_numbers<[1], [0], [0], [1], [0, 0, 1, 1], [], []>} : vector<8x128xf32>, vector<128x128xf32>, vector<8x128xf32> -> vector<8x128xf32>
    %c0_4 = arith.constant 0 : index
    %c0_5 = arith.constant 0 : index
    %6 = vector.load %arg9[%c0_4, %c0_5] : memref<1x128xf32, #tpu.memory_space<vmem>>, vector<1x128xf32>
    %7 = vector.broadcast %6 : vector<1x128xf32> to vector<8x128xf32>
    %8 = arith.addf %5, %7 : vector<8x128xf32>
    %c0_6 = arith.constant 0 : index
    %c0_7 = arith.constant 0 : index
    %9 = vector.load %arg10[%c0_6, %c0_7] : memref<8x128xf32, #tpu.memory_space<vmem>>, vector<8x128xf32>
    tpu.vector_store %arg10[%c0_6, %c0_7], %8 {strides = array<i32>} : memref<8x128xf32, #tpu.memory_space<vmem>>, vector<8x128xf32>,
    return
  }
  func.func @transform_0(%arg0: i32, %arg1: i32) -> (i32, i32) {
    %c0_i32 = arith.constant 0 : i32
    %c0_i32_0 = arith.constant 0 : i32
    return %arg0, %c0_i32 : i32, i32
  }
  func.func @transform_1(%arg0: i32, %arg1: i32) -> (i32, i32) {
    %c0_i32 = arith.constant 0 : i32
    %c0_i32_0 = arith.constant 0 : i32
    return %arg0, %c0_i32 : i32, i32
  }
  func.func @transform_2(%arg0: i32, %arg1: i32) -> (i32, i32) {
    %c0_i32 = arith.constant 0 : i32
    %c0_i32_0 = arith.constant 0 : i32
    %c0_i32_1 = arith.constant 0 : i32
    return %c0_i32, %c0_i32_0 : i32, i32
  }
  func.func @transform_3(%arg0: i32, %arg1: i32) -> (i32, i32) {
    %c0_i32 = arith.constant 0 : i32
    %c0_i32_0 = arith.constant 0 : i32
    %c0_i32_1 = arith.constant 0 : i32
    return %c0_i32, %c0_i32_0 : i32, i32
  }
  func.func @transform_4(%arg0: i32, %arg1: i32) -> (i32, i32) {
    %c0_i32 = arith.constant 0 : i32
    %c0_i32_0 = arith.constant 0 : i32
    %c0_i32_1 = arith.constant 0 : i32
    return %c0_i32, %c0_i32_0 : i32, i32
  }
  func.func @transform_5(%arg0: i32, %arg1: i32) -> (i32, i32) {
    %c0_i32 = arith.constant 0 : i32
    %c0_i32_0 = arith.constant 0 : i32
    return %c0_i32, %arg1 : i32, i32
  }
  func.func @transform_6(%arg0: i32, %arg1: i32) -> (i32, i32) {
    %c0_i32 = arith.constant 0 : i32
    %c0_i32_0 = arith.constant 0 : i32
    %c0_i32_1 = arith.constant 0 : i32
    return %c0_i32, %c0_i32_0 : i32, i32
  }
  func.func @transform_7(%arg0: i32, %arg1: i32) -> (i32, i32) {
    %c0_i32 = arith.constant 0 : i32
    %c0_i32_0 = arith.constant 0 : i32
    return %c0_i32, %arg1 : i32, i32
  }
  func.func @transform_8(%arg0: i32, %arg1: i32) -> (i32, i32) {
    %c0_i32 = arith.constant 0 : i32
    return %arg0, %arg1 : i32, i32
  }
}

module attributes {stable_mosaic.version = 11 : i64} {
  func.func @_decoder_kernel(%arg0: i32, %arg1: i32, %arg2: memref<8x16xf32, #tpu.memory_space<vmem>>, %arg3: memref<8x8xf32, #tpu.memory_space<vmem>>, %arg4: memref<16x128xf32, #tpu.memory_space<vmem>>, %arg5: memref<8x256xf32, #tpu.memory_space<vmem>>, %arg6: memref<128x128xf32, #tpu.memory_space<vmem>>, %arg7: memref<128x128xf32, #tpu.memory_space<vmem>>, %arg8: memref<2x128xf32, #tpu.memory_space<vmem>>, %arg9: memref<1x128xf32, #tpu.memory_space<vmem>>, %arg10: memref<8x128xf32, #tpu.memory_space<vmem>>, %arg11: memref<8x128xf32, #tpu.memory_space<vmem>>) attributes {dimension_semantics = [#tpu.dimension_semantics<parallel>, #tpu.dimension_semantics<arbitrary>], iteration_bounds = array<i64: 1, 1>, scalar_prefetch = 0 : i64, scratch_operands = 1 : i64, tpu.core_type = #tpu.core_type<tc>, window_params = [{transform_indices = @transform_0, window_bounds = array<i64: 8, 16>}, {transform_indices = @transform_1, window_bounds = array<i64: 8, 8>}, {pipeline_mode = #tpu.pipeline_mode<synchronous>, transform_indices = @transform_2, window_bounds = array<i64: 16, 128>}, {pipeline_mode = #tpu.pipeline_mode<synchronous>, transform_indices = @transform_3, window_bounds = array<i64: 8, 256>}, {pipeline_mode = #tpu.pipeline_mode<synchronous>, transform_indices = @transform_4, window_bounds = array<i64: 128, 128>}, {transform_indices = @transform_5, window_bounds = array<i64: 128, 128>}, {pipeline_mode = #tpu.pipeline_mode<synchronous>, transform_indices = @transform_6, window_bounds = array<i64: 2, 128>}, {transform_indices = @transform_7, window_bounds = array<i64: 1, 128>}, {transform_indices = @transform_8, window_bounds = array<i64: 8, 128>}]} {
    %c0_i32 = arith.constant 0 : i32
    %0 = arith.cmpi eq, %arg1, %c0_i32 : i32
    %1 = arith.extui %0 : i1 to i32
    %c0_i32_0 = arith.constant 0 : i32
    %2 = arith.cmpi ne, %1, %c0_i32_0 : i32
    scf.if %2 {
      %c0_8 = arith.constant 0 : index
      %c0_9 = arith.constant 0 : index
      %10 = vector.load %arg3[%c0_8, %c0_9] : memref<8x8xf32, #tpu.memory_space<vmem>>, vector<8x8xf32>
      %c0_10 = arith.constant 0 : index
      %c0_11 = arith.constant 0 : index
      %11 = vector.load %arg5[%c0_10, %c0_11] : memref<8x256xf32, #tpu.memory_space<vmem>>, vector<8x256xf32>
      %cst_12 = arith.constant dense<0.000000e+00> : vector<8x256xf32>
      %12 = tpu.matmul %10, %11, %cst_12 {dimension_numbers = #tpu.dot_dimension_numbers<[1], [0], [0], [1], [0, 0, 1, 1], [], []>} : vector<8x8xf32>, vector<8x256xf32>, vector<8x256xf32> -> vector<8x256xf32>
      %c0_13 = arith.constant 0 : index
      %c0_14 = arith.constant 0 : index
      %13 = vector.load %arg2[%c0_13, %c0_14] : memref<8x16xf32, #tpu.memory_space<vmem>>, vector<8x16xf32>
      %c0_15 = arith.constant 0 : index
      %c0_16 = arith.constant 0 : index
      %14 = vector.load %arg4[%c0_15, %c0_16] : memref<16x128xf32, #tpu.memory_space<vmem>>, vector<16x128xf32>
      %cst_17 = arith.constant dense<0.000000e+00> : vector<8x128xf32>
      %15 = tpu.matmul %13, %14, %cst_17 {dimension_numbers = #tpu.dot_dimension_numbers<[1], [0], [0], [1], [0, 0, 1, 1], [], []>} : vector<8x16xf32>, vector<16x128xf32>, vector<8x128xf32> -> vector<8x128xf32>
      %16 = vector.extract_strided_slice %12 {offsets = [0, 0], sizes = [8, 128], strides = [1, 1]} : vector<8x256xf32> to vector<8x128xf32>
      %17 = arith.addf %15, %16 : vector<8x128xf32>
      %c0_18 = arith.constant 0 : index
      %c0_19 = arith.constant 0 : index
      %18 = vector.load %arg8[%c0_18, %c0_19] : memref<2x128xf32, #tpu.memory_space<vmem>>, vector<1x128xf32>
      %19 = vector.broadcast %18 : vector<1x128xf32> to vector<8x128xf32>
      %20 = arith.addf %17, %19 : vector<8x128xf32>
      %cst_20 = arith.constant 0.000000e+00 : f32
      %21 = vector.broadcast %cst_20 : f32 to vector<8x128xf32>
      %22 = arith.cmpf ogt, %20, %21 : vector<8x128xf32>
      %cst_21 = arith.constant 2.000000e-01 : f32
      %23 = vector.broadcast %cst_21 : f32 to vector<8x128xf32>
      %24 = arith.mulf %23, %20 : vector<8x128xf32>
      %25 = arith.select %22, %20, %24 : vector<8x128xi1>, vector<8x128xf32>
      %c0_22 = arith.constant 0 : index
      %c0_23 = arith.constant 0 : index
      %26 = vector.load %arg6[%c0_22, %c0_23] : memref<128x128xf32, #tpu.memory_space<vmem>>, vector<128x128xf32>
      %cst_24 = arith.constant dense<0.000000e+00> : vector<8x128xf32>
      %27 = tpu.matmul %25, %26, %cst_24 {dimension_numbers = #tpu.dot_dimension_numbers<[1], [0], [0], [1], [0, 0, 1, 1], [], []>} : vector<8x128xf32>, vector<128x128xf32>, vector<8x128xf32> -> vector<8x128xf32>
      %28 = vector.extract_strided_slice %12 {offsets = [0, 128], sizes = [8, 128], strides = [1, 1]} : vector<8x256xf32> to vector<8x128xf32>
      %29 = arith.addf %27, %28 : vector<8x128xf32>
      %c1 = arith.constant 1 : index
      %c0_25 = arith.constant 0 : index
      %30 = vector.load %arg8[%c1, %c0_25] : memref<2x128xf32, #tpu.memory_space<vmem>>, vector<1x128xf32>
      %31 = vector.broadcast %30 : vector<1x128xf32> to vector<8x128xf32>
      %32 = arith.addf %29, %31 : vector<8x128xf32>
      %cst_26 = arith.constant 0.000000e+00 : f32
      %33 = vector.broadcast %cst_26 : f32 to vector<8x128xf32>
      %34 = arith.cmpf ogt, %32, %33 : vector<8x128xf32>
      %cst_27 = arith.constant 2.000000e-01 : f32
      %35 = vector.broadcast %cst_27 : f32 to vector<8x128xf32>
      %36 = arith.mulf %35, %32 : vector<8x128xf32>
      %37 = arith.select %34, %32, %36 : vector<8x128xi1>, vector<8x128xf32>
      %c0_28 = arith.constant 0 : index
      %c0_29 = arith.constant 0 : index
      %38 = vector.load %arg11[%c0_28, %c0_29] : memref<8x128xf32, #tpu.memory_space<vmem>>, vector<8x128xf32>
      tpu.vector_store %arg11[%c0_28, %c0_29], %37 {strides = array<i32>} : memref<8x128xf32, #tpu.memory_space<vmem>>, vector<8x128xf32>,
    } else {
    }
    %c0 = arith.constant 0 : index
    %c0_1 = arith.constant 0 : index
    %3 = vector.load %arg11[%c0, %c0_1] : memref<8x128xf32, #tpu.memory_space<vmem>>, vector<8x128xf32>
    %c0_2 = arith.constant 0 : index
    %c0_3 = arith.constant 0 : index
    %4 = vector.load %arg7[%c0_2, %c0_3] : memref<128x128xf32, #tpu.memory_space<vmem>>, vector<128x128xf32>
    %cst = arith.constant dense<0.000000e+00> : vector<8x128xf32>
    %5 = tpu.matmul %3, %4, %cst {dimension_numbers = #tpu.dot_dimension_numbers<[1], [0], [0], [1], [0, 0, 1, 1], [], []>} : vector<8x128xf32>, vector<128x128xf32>, vector<8x128xf32> -> vector<8x128xf32>
    %c0_4 = arith.constant 0 : index
    %c0_5 = arith.constant 0 : index
    %6 = vector.load %arg9[%c0_4, %c0_5] : memref<1x128xf32, #tpu.memory_space<vmem>>, vector<1x128xf32>
    %7 = vector.broadcast %6 : vector<1x128xf32> to vector<8x128xf32>
    %8 = arith.addf %5, %7 : vector<8x128xf32>
    %c0_6 = arith.constant 0 : index
    %c0_7 = arith.constant 0 : index
    %9 = vector.load %arg10[%c0_6, %c0_7] : memref<8x128xf32, #tpu.memory_space<vmem>>, vector<8x128xf32>
    tpu.vector_store %arg10[%c0_6, %c0_7], %8 {strides = array<i32>} : memref<8x128xf32, #tpu.memory_space<vmem>>, vector<8x128xf32>,
    return
  }
  func.func @transform_0(%arg0: i32, %arg1: i32) -> (i32, i32) {
    %c0_i32 = arith.constant 0 : i32
    %c0_i32_0 = arith.constant 0 : i32
    return %arg0, %c0_i32 : i32, i32
  }
  func.func @transform_1(%arg0: i32, %arg1: i32) -> (i32, i32) {
    %c0_i32 = arith.constant 0 : i32
    %c0_i32_0 = arith.constant 0 : i32
    return %arg0, %c0_i32 : i32, i32
  }
  func.func @transform_2(%arg0: i32, %arg1: i32) -> (i32, i32) {
    %c0_i32 = arith.constant 0 : i32
    %c0_i32_0 = arith.constant 0 : i32
    %c0_i32_1 = arith.constant 0 : i32
    return %c0_i32, %c0_i32_0 : i32, i32
  }
  func.func @transform_3(%arg0: i32, %arg1: i32) -> (i32, i32) {
    %c0_i32 = arith.constant 0 : i32
    %c0_i32_0 = arith.constant 0 : i32
    %c0_i32_1 = arith.constant 0 : i32
    return %c0_i32, %c0_i32_0 : i32, i32
  }
  func.func @transform_4(%arg0: i32, %arg1: i32) -> (i32, i32) {
    %c0_i32 = arith.constant 0 : i32
    %c0_i32_0 = arith.constant 0 : i32
    %c0_i32_1 = arith.constant 0 : i32
    return %c0_i32, %c0_i32_0 : i32, i32
  }
  func.func @transform_5(%arg0: i32, %arg1: i32) -> (i32, i32) {
    %c0_i32 = arith.constant 0 : i32
    %c0_i32_0 = arith.constant 0 : i32
    return %c0_i32, %arg1 : i32, i32
  }
  func.func @transform_6(%arg0: i32, %arg1: i32) -> (i32, i32) {
    %c0_i32 = arith.constant 0 : i32
    %c0_i32_0 = arith.constant 0 : i32
    %c0_i32_1 = arith.constant 0 : i32
    return %c0_i32, %c0_i32_0 : i32, i32
  }
  func.func @transform_7(%arg0: i32, %arg1: i32) -> (i32, i32) {
    %c0_i32 = arith.constant 0 : i32
    %c0_i32_0 = arith.constant 0 : i32
    return %c0_i32, %arg1 : i32, i32
  }
  func.func @transform_8(%arg0: i32, %arg1: i32) -> (i32, i32) {
    %c0_i32 = arith.constant 0 : i32
    return %arg0, %arg1 : i32, i32
  }
}

</mosaic_0001>

<bundles_post_ra>
// kernel: tpu_custom_call.1
= control target key start
LH: loop header
LB: loop body
LE: loop exit
PB: predicated region body
PF: predicated region fallthrough
CT: control target
= control target key end

     0   :  { %13 = vsyncpa [#allocation4], 0  ;;  %s1022_s0 = inlined_call_operand.hbm [shape: f32[8,16], index: 0, kind: input, shape index: {}]   ;;  %s1023_s1 = inlined_call_operand.hbm [shape: f32[8,8], index: 1, kind: input, shape index: {}]   ;;  %s1024_s2 = inlined_call_operand.hbm [shape: f32[16,128], index: 2, kind: input, shape index: {}]   ;;  %s1025_s3 = inlined_call_operand.hbm [shape: f32[8,256], index: 3, kind: input, shape index: {}]   ;;  %s1026_s4 = inlined_call_operand.hbm [shape: f32[128,128], index: 4, kind: input, shape index: {}]   ;;  %s1027_s5 = inlined_call_operand.hbm [shape: f32[128,128], index: 5, kind: input, shape index: {}]   ;;  %s1028_s6 = inlined_call_operand.vmem [shape: f32[2,128], index: 6, kind: input, shape index: {}]   ;;  %s1029_s7 = inlined_call_operand.vmem [shape: f32[1,128], index: 7, kind: input, shape index: {}]   ;;  %s1030_s8 = inlined_call_operand.hbm [shape: f32[8,128], index: 8, kind: output, shape index: {}]  }
   0x1   :  { %14 = vsyncpa [#allocation7], 0 }
   0x2   :  { %15 = vsyncpa [#allocation10], 0 }
   0x3   :  { %16 = vsyncpa [#allocation13], 0 }
   0x4   :  { %17 = vsyncpa [#allocation5], 0  ;;  %s829_s27 = smov [#allocation6]   ;;  %s830_s29 = smov [#allocation9]  }
   0x5   :  { %s34_s28 = sshll.u32 %s829_s27, 4  ;;  %s56_s30 = sshll.u32 %s830_s29, 4  ;;  %s35_s28 = int_to_ptr.vmem [resolvable:$true] %s34_s28  ;;  %s57_s30 = int_to_ptr.vmem [resolvable:$true] %s56_s30 }
   0x6   :  { %s665_s11 = scalar_lea.hbm %s1023_s1, 128 }
   0x7   :  { %p666_p0 = scmp.ne.s32.totalorder %s1023_s1, %s665_s11  ;;  %p669_p1 = scmp.lt.u32.totalorder %s665_s11, %s1023_s1 }
   0x9   :  { %p671_p2 = pnand %p669_p1, %p666_p0 }
   0xb   :  { %674 = shalt.err (!%p671_p2)
}
   0xc   :  { %s675_s16 = scalar_lea.vmem %s35_s28, 128  ;;  %p680_p4 = scmp.lt.s32.totalorder %s35_s28, %s35_s28 }
   0xd   :  { %p676_p3 = scmp.ne.s32.totalorder %s35_s28, %s675_s16  ;;  %p681_p5 = scmp.lt.s32.totalorder %s675_s16, %s675_s16 }
   0xf   :  { %p682_p6 = por %p681_p5, %p680_p4 }
  0x11   :  { %p683_p7 = pnand %p682_p6, %p676_p3 }
  0x13   :  { %686 = shalt.err (!%p683_p7)
}
  0x14   :  { %37 = dma.hbm_to_vmem [thread:$0]  %s1023_s1, 128, %s35_s28, [#allocation7]  }
  0x15   :  { %s687_s21 = scalar_lea.hbm %s1025_s3, 256 }
  0x16   :  { %p688_p8 = scmp.ne.s32.totalorder %s1025_s3, %s687_s21  ;;  %p691_p9 = scmp.lt.u32.totalorder %s687_s21, %s1025_s3 }
  0x18   :  { %p693_p10 = pnand %p691_p9, %p688_p8 }
  0x1a   :  { %696 = shalt.err (!%p693_p10)
}
  0x1b   :  { %s697_s26 = scalar_lea.vmem %s57_s30, 256  ;;  %p702_p12 = scmp.lt.s32.totalorder %s57_s30, %s57_s30 }
  0x1c   :  { %p698_p11 = scmp.ne.s32.totalorder %s57_s30, %s697_s26  ;;  %p703_p13 = scmp.lt.s32.totalorder %s697_s26, %s697_s26 }
  0x1e   :  { %p704_p0 = por %p703_p13, %p702_p12 }
  0x20   :  { %p705_p1 = pnand %p704_p0, %p698_p11 }
  0x22   :  { %708 = shalt.err (!%p705_p1)
}
  0x23   :  { %59 = dma.hbm_to_vmem [thread:$0]  %s1025_s3, 256, %s57_s30, [#allocation10]  }
  0x24   :  { %s831_s28 = smov [#allocation3]   ;;  %s832_s9 = smov [#allocation8]  }
  0x25   :  { %s24_s29 = sshll.u32 %s831_s28, 4  ;;  %s43_s10 = sshll.u32 %s832_s9, 4  ;;  %s25_s29 = int_to_ptr.vmem [resolvable:$true] %s24_s29  ;;  %s910_s10 = int_to_ptr.vmem [resolvable:$true] %s43_s10 }
  0x26   :  { %s709_s13 = scalar_lea.hbm %s1022_s0, 128 }
  0x27   :  { %p710_p2 = scmp.ne.s32.totalorder %s1022_s0, %s709_s13  ;;  %p713_p3 = scmp.lt.u32.totalorder %s709_s13, %s1022_s0 }
  0x29   :  { %p715_p4 = pnand %p713_p3, %p710_p2 }
  0x2b   :  { %718 = shalt.err (!%p715_p4)
}
  0x2c   :  { %s719_s3 = scalar_lea.vmem %s25_s29, 128  ;;  %p724_p6 = scmp.lt.s32.totalorder %s25_s29, %s25_s29 }
  0x2d   :  { %p720_p5 = scmp.ne.s32.totalorder %s25_s29, %s719_s3  ;;  %p725_p7 = scmp.lt.s32.totalorder %s719_s3, %s719_s3 }
  0x2f   :  { %p726_p8 = por %p725_p7, %p724_p6 }
  0x31   :  { %p727_p9 = pnand %p726_p8, %p720_p5 }
  0x33   :  { %730 = shalt.err (!%p727_p9)
}
  0x34   :  { %27 = dma.hbm_to_vmem [thread:$0]  %s1022_s0, 128, %s25_s29, [#allocation4]  }
  0x35   :  { %s731_s21 = scalar_lea.hbm %s1024_s2, 256 }
  0x36   :  { %p732_p10 = scmp.ne.s32.totalorder %s1024_s2, %s731_s21  ;;  %p735_p11 = scmp.lt.u32.totalorder %s731_s21, %s1024_s2 }
  0x38   :  { %p737_p12 = pnand %p735_p11, %p732_p10 }
  0x3a   :  { %740 = shalt.err (!%p737_p12)
}
  0x3b   :  { %s741_s26 = scalar_lea.vmem %s910_s10, 256  ;;  %p746_p0 = scmp.lt.s32.totalorder %s910_s10, %s910_s10 }
  0x3c   :  { %p742_p13 = scmp.ne.s32.totalorder %s910_s10, %s741_s26  ;;  %p747_p1 = scmp.lt.s32.totalorder %s741_s26, %s741_s26 }
  0x3e   :  { %p748_p2 = por %p747_p1, %p746_p0 }
  0x40   :  { %p749_p3 = pnand %p748_p2, %p742_p13 }
  0x42   :  { %752 = shalt.err (!%p749_p3)
}
  0x43   :  { %s833_s0 = smov 128   ;;  %s834_s1 = smov 8  }
  0x44   :  { %49 = dma.hbm_to_vmem [thread:$0]  %s1024_s2, 256, %s910_s10, [#allocation7], %s833_s0, %s833_s0, %s834_s1  }
  0x45   :  { %s835_s29 = smov [#allocation11]   ;;  %s836_s11 = smov [#allocation12]  }
  0x46   :  { %s65_s9 = sshll.u32 %s835_s29, 4  ;;  %s77_s12 = sshll.u32 %s836_s11, 4  ;;  %s66_s9 = int_to_ptr.vmem [resolvable:$true] %s65_s9  ;;  %s944_s12 = int_to_ptr.vmem [resolvable:$true] %s77_s12 }
  0x47   :  { %s753_s15 = scalar_lea.hbm %s1026_s4, 2048 }
  0x48   :  { %p754_p4 = scmp.ne.s32.totalorder %s1026_s4, %s753_s15  ;;  %p757_p5 = scmp.lt.u32.totalorder %s753_s15, %s1026_s4 }
  0x4a   :  { %p759_p6 = pnand %p757_p5, %p754_p4 }
  0x4c   :  { %762 = shalt.err (!%p759_p6)
}
  0x4d   :  { %s763_s2 = scalar_lea.vmem %s66_s9, 2048  ;;  %p768_p8 = scmp.lt.s32.totalorder %s66_s9, %s66_s9 }
  0x4e   :  { %p764_p7 = scmp.ne.s32.totalorder %s66_s9, %s763_s2  ;;  %p769_p9 = scmp.lt.s32.totalorder %s763_s2, %s763_s2 }
  0x50   :  { %p770_p10 = por %p769_p9, %p768_p8 }
  0x52   :  { %p771_p11 = pnand %p770_p10, %p764_p7 }
  0x54   :  { %774 = shalt.err (!%p771_p11)
}
  0x55   :  { %71 = dma.hbm_to_vmem [thread:$0]  %s1026_s4, 2048, %s66_s9, [#allocation10], %s833_s0, %s833_s0, %s834_s1  }
  0x56   :  { %s775_s21 = scalar_lea.hbm %s1027_s5, 2048 }
  0x57   :  { %p776_p12 = scmp.ne.s32.totalorder %s1027_s5, %s775_s21  ;;  %p779_p13 = scmp.lt.u32.totalorder %s775_s21, %s1027_s5 }
  0x59   :  { %p781_p0 = pnand %p779_p13, %p776_p12 }
  0x5b   :  { %784 = shalt.err (!%p781_p0)
}
  0x5c   :  { %s785_s26 = scalar_lea.vmem %s944_s12, 2048  ;;  %p790_p2 = scmp.lt.s32.totalorder %s944_s12, %s944_s12 }
  0x5d   :  { %p786_p1 = scmp.ne.s32.totalorder %s944_s12, %s785_s26  ;;  %p791_p3 = scmp.lt.s32.totalorder %s785_s26, %s785_s26 }
  0x5f   :  { %p792_p4 = por %p791_p3, %p790_p2 }
  0x61   :  { %p793_p5 = pnand %p792_p4, %p786_p1 }
  0x63   :  { %796 = shalt.err (!%p793_p5)
}
  0x64   :  { %83 = dma.hbm_to_vmem [thread:$0]  %s1027_s5, 2048, %s944_s12, [#allocation13], %s833_s0, %s833_s0, %s834_s1  }
  0x65   :  { %819 = dma.done.wait [#allocation4], 128  }
  0x66   :  { %820 = vsyncadd [#allocation4], 4294967168 }
  0x67   :  { %821 = dma.done.wait [#allocation7], 384  }
  0x68   :  { %822 = vsyncadd [#allocation7], 4294966912 }
  0x69   :  { %823 = dma.done.wait [#allocation10], 2304  }
  0x6a   :  { %824 = vsyncadd [#allocation10], 4294964992 }
  0x6b   :  { %825 = dma.done.wait [#allocation13], 2048  }
  0x6c   :  { %826 = vsyncadd [#allocation13], 4294965248  ;;  %v837_v0 = vmov 0.0|0.0   ;;  %v838_v1 = vmov 0.0   ;;  %vm839_vm0 = vmmov 0   ;;  %v112_v2 = vld [vmem:[#allocation9 + $0x8] sm:$0xff] }
  0x6d   :  { %602 = vmatprep.subr.bf16.mxu1 %v837_v0  ;;  %181 = vmatprep.mubr.f32.mxu0 %v838_v1  ;;  %v189_v3 = vld [vmem:[#allocation8] sm:$0xff]  ;;  %v190_v4 = vld [vmem:[#allocation8 + $0x8] sm:$0xff]  ;;  %vm113_vm1 = vcmask 64512   ;;  %v111_v6 = vld [vmem:[#allocation9] sm:$0xff]  ;;  %vm191_vm2 = vcmask 130048   ;;  %s840_s11 = smov [#allocation14]  }
  0x6e   :  { %529 = vmatprep.mubr.msk.f32.mxu1 %vm839_vm0, %v838_v1  ;;  %117 = vmatprep.subr.mxu0 %v112_v2  ;;  %v603_v5 = vpack.c.bf16 %v190_v4, %v189_v3  ;;  %v110_v7 = vld [vmem:[#allocation6] sm:$0xff]  ;;  %v274_v8 = vld [vmem:[#allocation11] sm:$0xff]  ;;  %v275_v9 = vld [vmem:[#allocation11 + $0x8] sm:$0xff]  ;;  %s471_s12 = sshll.u32 %s840_s11, 4  ;;  %s472_s12 = int_to_ptr.vmem [resolvable:$true] %s471_s12 }
  0x6f   :  { %118 = vmatpush1.msra.mxu0 %v111_v6  ;;  %v276_v10 = vld [vmem:[#allocation11 + $0x10] sm:$0xff]  ;;  %v606_v12 = vpack.c.bf16 %v275_v9, %v274_v8  ;;  %v277_v13 = vld [vmem:[#allocation11 + $0x18] sm:$0xff]  ;;  %v278_v15 = vld [vmem:[#allocation11 + $0x20] sm:$0xff]  ;;  %s797_s13 = scalar_lea.vmem %s472_s12, 128  ;;  %p802_p7 = scmp.lt.s32.totalorder %s472_s12, %s472_s12 }
  0x70   :  { %604 = vmatpush3.bf16.msra.mxu1 %v603_v5  ;;  %483 = vmatmul.mubr.msk.f32.vlgmr.msra.gmra.mrb[0].mxu0 %vm113_vm1, %v110_v7  ;;  %v188_v11 = vld [vmem:[#allocation3] sm:$0xff]  ;;  %v609_v14 = vpack.c.bf16 %v277_v13, %v276_v10  ;;  %v279_v16 = vld [vmem:[#allocation11 + $0x28] sm:$0xff]  ;;  %v281_v19 = vld [vmem:[#allocation11 + $0x38] sm:$0xff]  ;;  %p798_p6 = scmp.ne.s32.totalorder %s472_s12, %s797_s13  ;;  %p803_p8 = scmp.lt.s32.totalorder %s797_s13, %s797_s13 }
  0x71   :  { %605 = vmatprep.subr.bf16.mxu0 %v837_v0  ;;  %564 = vmatprep.mubr.msk.f32.mxu0 %vm839_vm0, %v838_v1  ;;  %v612_v17 = vpack.c.bf16 %v279_v16, %v278_v15  ;;  %v280_v18 = vld [vmem:[#allocation11 + $0x30] sm:$0xff]  ;;  %v282_v21 = vld [vmem:[#allocation11 + $0x40] sm:$0xff]  ;;  %v283_v22 = vld [vmem:[#allocation11 + $0x48] sm:$0xff] }
  0x72   :  { %607 = vmatpush3.bf16.msra.mxu0 %v606_v12  ;;  %629 = vmatprep.subr.bf16.mxu1 %v837_v0  ;;  %v615_v20 = vpack.c.bf16 %v281_v19, %v280_v18  ;;  %v618_v23 = vpack.c.bf16 %v283_v22, %v282_v21  ;;  %v284_v24 = vld [vmem:[#allocation11 + $0x50] sm:$0xff]  ;;  %v285_v25 = vld [vmem:[#allocation11 + $0x58] sm:$0xff]  ;;  %v286_v27 = vld [vmem:[#allocation11 + $0x60] sm:$0xff]  ;;  %p804_p9 = por %p803_p8, %p802_p7 }
  0x73   :  { %530 = vmatmul.mubr.msk.f32.vlgmr.msra.gmra.mrb[0].mxu1 %vm191_vm2, %v188_v11  ;;  %608 = vmatprep.subr.bf16.mxu0 %v837_v0  ;;  %v621_v26 = vpack.c.bf16 %v285_v25, %v284_v24  ;;  %v287_v28 = vld [vmem:[#allocation11 + $0x68] sm:$0xff]  ;;  %v288_v30 = vld [vmem:[#allocation11 + $0x70] sm:$0xff]  ;;  %v289_v31 = vld [vmem:[#allocation11 + $0x78] sm:$0xff] }
  0x74   :  { %599 = vmatprep.mubr.msk.f32.mxu1 %vm839_vm0, %v838_v1  ;;  %v624_v29 = vpack.c.bf16 %v287_v28, %v286_v27  ;;  %v627_v32 = vpack.c.bf16 %v289_v31, %v288_v30  ;;  %v371_v33 = vld [vmem:[#allocation12] sm:$0xff]  ;;  %v372_v34 = vld [vmem:[#allocation12 + $0x8] sm:$0xff]  ;;  %v373_v35 = vld [vmem:[#allocation12 + $0x10] sm:$0xff]  ;;  %p805_p10 = pnand %p804_p9, %p798_p6 }
  0x75   :  { %v630_v36 = vpack.c.bf16 %v372_v34, %v371_v33  ;;  %v374_v37 = vld [vmem:[#allocation12 + $0x18] sm:$0xff]  ;;  %v375_v39 = vld [vmem:[#allocation12 + $0x20] sm:$0xff]  ;;  %v376_v40 = vld [vmem:[#allocation12 + $0x28] sm:$0xff] }
  0x76   :  { %610 = vmatpush3.bf16.msra.mxu0 %v609_v14  ;;  %v633_v38 = vpack.c.bf16 %v374_v37, %v373_v35  ;;  %v636_v41 = vpack.c.bf16 %v376_v40, %v375_v39  ;;  %v377_v42 = vld [vmem:[#allocation12 + $0x30] sm:$0xff]  ;;  %v378_v43 = vld [vmem:[#allocation12 + $0x38] sm:$0xff]  ;;  %v379_v45 = vld [vmem:[#allocation12 + $0x40] sm:$0xff] }
  0x77   :  { %611 = vmatprep.subr.bf16.mxu0 %v837_v0  ;;  %631 = vmatpush3.bf16.msra.mxu1 %v630_v36  ;;  %v639_v44 = vpack.c.bf16 %v378_v43, %v377_v42  ;;  %v380_v46 = vld [vmem:[#allocation12 + $0x48] sm:$0xff]  ;;  %v381_v48 = vld [vmem:[#allocation12 + $0x50] sm:$0xff]  ;;  %v382_v49 = vld [vmem:[#allocation12 + $0x58] sm:$0xff] }
  0x78   :  { %632 = vmatprep.subr.bf16.mxu1 %v837_v0  ;;  %v642_v47 = vpack.c.bf16 %v380_v46, %v379_v45  ;;  %v645_v50 = vpack.c.bf16 %v382_v49, %v381_v48  ;;  %v485_v54 = vld [vmem:[%s1028_s6] ss:$0 sm:$0xff]  ;;  %v383_v60 = vld [vmem:[#allocation12 + $0x60] sm:$0xff]  ;;  %v384_v61 = vld [vmem:[#allocation12 + $0x68] sm:$0xff] }
  0x79   :  { %v648_v62 = vpack.c.bf16 %v384_v61, %v383_v60  ;;  %v385_v63 = vld [vmem:[#allocation12 + $0x70] sm:$0xff]  ;;  %v386_v1 = vld [vmem:[#allocation12 + $0x78] sm:$0xff] }
  0x7a   :  { %613 = vmatpush3.bf16.msra.mxu0 %v612_v17  ;;  %v651_v2 = vpack.c.bf16 %v386_v1, %v385_v63  ;;  %v486_v4 = vld [vmem:[%s1028_s6 + $0x1] ss:$0 sm:$0xff] }
  0x7b   :  { %614 = vmatprep.subr.bf16.mxu0 %v837_v0  ;;  %634 = vmatpush3.bf16.msra.mxu1 %v633_v38 }
  0x7c   :  { %635 = vmatprep.subr.bf16.mxu1 %v837_v0 }
  0x7e   :  { %616 = vmatpush3.bf16.msra.mxu0 %v615_v20 }
  0x7f   :  { %617 = vmatprep.subr.bf16.mxu0 %v837_v0  ;;  %637 = vmatpush3.bf16.msra.mxu1 %v636_v41 }
  0x80   :  { %638 = vmatprep.subr.bf16.mxu1 %v837_v0 }
  0x82   :  { %619 = vmatpush3.bf16.msra.mxu0 %v618_v23 }
  0x83   :  { %620 = vmatprep.subr.bf16.mxu0 %v837_v0  ;;  %640 = vmatpush3.bf16.msra.mxu1 %v639_v44 }
  0x84   :  { %641 = vmatprep.subr.bf16.mxu1 %v837_v0 }
  0x86   :  { %622 = vmatpush3.bf16.msra.mxu0 %v621_v26 }
  0x87   :  { %623 = vmatprep.subr.bf16.mxu0 %v837_v0  ;;  %643 = vmatpush3.bf16.msra.mxu1 %v642_v47 }
  0x88   :  { %644 = vmatprep.subr.bf16.mxu1 %v837_v0 }
  0x8a   :  { %625 = vmatpush3.bf16.msra.mxu0 %v624_v29 }
  0x8b   :  { %626 = vmatprep.subr.bf16.mxu0 %v837_v0  ;;  %646 = vmatpush3.bf16.msra.mxu1 %v645_v50 }
  0x8c   :  { %647 = vmatprep.subr.bf16.mxu1 %v837_v0 }
  0x8e   :  { %628 = vmatpush3.bf16.msra.mxu0 %v627_v32 }
  0x8f   :  { %649 = vmatpush3.bf16.msra.mxu1 %v648_v62 }
  0x90   :  { %650 = vmatprep.subr.bf16.mxu1 %v837_v0  ;;  %v487_v0 = vld [vmem:[%s1029_s7] ss:$0 sm:$0xff] }
  0x93   :  { %652 = vmatpush3.bf16.msra.mxu1 %v651_v2 }
 0x143   :  { %v183_v51 = vpop.f32.mrb[0].mxu0 }
 0x144   :  { %v185_v52 = vpop.f32.mrb[1].mxu0 }
 0x146   :  { %v261_v53 = vpop.f32.mrb[0].mxu1 }
 0x147   :  { %v262_v55 = vadd.f32 %v261_v53, %v183_v51  ;;  %v531_v56 = vpop.f32.mrb[1].mxu1 }
 0x149   :  { %v270_v57 = vadd.f32 %v485_v54, %v262_v55 }
 0x14b   :  { %v272_v58 = vmul.f32 0.2, %v270_v57  ;;  %vm271_vm3 = vcmp.gt.f32.partialorder %v270_v57, 0.0 }
 0x14d   :  { %v273_v59 = vsel %vm271_vm3, %v270_v57, %v272_v58 }
 0x14e   :  { %565 = vmatmul.mubr.f32.vlgmr.msra.gmra.mrb[2].mxu0 %v273_v59 }
 0x221   :  { %v356_v3 = vpop.f32.mrb[2].mxu0 }
 0x222   :  { %v357_v5 = vadd.f32 %v356_v3, %v185_v52  ;;  %v566_v6 = vpop.f32.mrb[3].mxu0 }
 0x224   :  { %v365_v7 = vadd.f32 %v486_v4, %v357_v5 }
 0x226   :  { %v367_v8 = vmul.f32 0.2, %v365_v7  ;;  %vm366_vm4 = vcmp.gt.f32.partialorder %v365_v7, 0.0 }
 0x228   :  { %v368_v9 = vsel %vm366_vm4, %v365_v7, %v367_v8 }
 0x229   :  { %600 = vmatmul.mubr.f32.vlgmr.msra.gmra.mrb[2].mxu1 %v368_v9 }
 0x2fc   :  { %v460_v10 = vpop.f32.mrb[2].mxu1 }
 0x2fd   :  { %v461_v11 = vadd.f32 %v487_v0, %v460_v10  ;;  %v601_v12 = vpop.f32.mrb[3].mxu1 }
 0x2ff   :  { %464 = vst [vmem:[#allocation14] sm:$0xff] %v461_v11 }
 0x300   :  { %808 = shalt.err (!%p805_p10)
}
 0x301   :  { %s809_s15 = scalar_lea.hbm %s1030_s8, 128 }
 0x302   :  { %p810_p11 = scmp.ne.s32.totalorder %s1030_s8, %s809_s15  ;;  %p813_p12 = scmp.lt.u32.totalorder %s809_s15, %s1030_s8 }
 0x304   :  { %p815_p13 = pnand %p813_p12, %p810_p11 }
 0x306   :  { %818 = shalt.err (!%p815_p13)
}
 0x307   :  { %474 = dma.vmem_to_hbm [thread:$0]  %s472_s12, 128, %s1030_s8, [#allocation5]  }
 0x308   :  { %827 = dma.done.wait [#allocation5], 128  }
 0x309   :  { %828 = vsyncadd [#allocation5], 4294967168 }
 0x30a   :  { %478 = vsyncpa [#allocation4], 1 }
 0x30b   :  { %479 = vsyncpa [#allocation7], 1 }
 0x30c   :  { %480 = vsyncpa [#allocation10], 1 }
 0x30d   :  { %481 = vsyncpa [#allocation13], 1 }
 0x30e   :  { %482 = vsyncpa [#allocation5], 1 }

// kernel: tpu_custom_call.1
= control target key start
LH: loop header
LB: loop body
LE: loop exit
PB: predicated region body
PF: predicated region fallthrough
CT: control target
= control target key end

     0   :  { %13 = vsyncpa [#allocation4], 0  ;;  %s1022_s0 = inlined_call_operand.hbm [shape: f32[8,16], index: 0, kind: input, shape index: {}]   ;;  %s1023_s1 = inlined_call_operand.hbm [shape: f32[8,8], index: 1, kind: input, shape index: {}]   ;;  %s1024_s2 = inlined_call_operand.hbm [shape: f32[16,128], index: 2, kind: input, shape index: {}]   ;;  %s1025_s3 = inlined_call_operand.hbm [shape: f32[8,256], index: 3, kind: input, shape index: {}]   ;;  %s1026_s4 = inlined_call_operand.hbm [shape: f32[128,128], index: 4, kind: input, shape index: {}]   ;;  %s1027_s5 = inlined_call_operand.hbm [shape: f32[128,128], index: 5, kind: input, shape index: {}]   ;;  %s1028_s6 = inlined_call_operand.vmem [shape: f32[2,128], index: 6, kind: input, shape index: {}]   ;;  %s1029_s7 = inlined_call_operand.vmem [shape: f32[1,128], index: 7, kind: input, shape index: {}]   ;;  %s1030_s8 = inlined_call_operand.hbm [shape: f32[8,128], index: 8, kind: output, shape index: {}]  }
   0x1   :  { %14 = vsyncpa [#allocation7], 0 }
   0x2   :  { %15 = vsyncpa [#allocation10], 0 }
   0x3   :  { %16 = vsyncpa [#allocation13], 0 }
   0x4   :  { %17 = vsyncpa [#allocation5], 0  ;;  %s829_s27 = smov [#allocation6]   ;;  %s830_s29 = smov [#allocation9]  }
   0x5   :  { %s34_s28 = sshll.u32 %s829_s27, 4  ;;  %s56_s30 = sshll.u32 %s830_s29, 4  ;;  %s35_s28 = int_to_ptr.vmem [resolvable:$true] %s34_s28  ;;  %s57_s30 = int_to_ptr.vmem [resolvable:$true] %s56_s30 }
   0x6   :  { %s665_s11 = scalar_lea.hbm %s1023_s1, 128 }
   0x7   :  { %p666_p0 = scmp.ne.s32.totalorder %s1023_s1, %s665_s11  ;;  %p669_p1 = scmp.lt.u32.totalorder %s665_s11, %s1023_s1 }
   0x9   :  { %p671_p2 = pnand %p669_p1, %p666_p0 }
   0xb   :  { %674 = shalt.err (!%p671_p2)
}
   0xc   :  { %s675_s16 = scalar_lea.vmem %s35_s28, 128  ;;  %p680_p4 = scmp.lt.s32.totalorder %s35_s28, %s35_s28 }
   0xd   :  { %p676_p3 = scmp.ne.s32.totalorder %s35_s28, %s675_s16  ;;  %p681_p5 = scmp.lt.s32.totalorder %s675_s16, %s675_s16 }
   0xf   :  { %p682_p6 = por %p681_p5, %p680_p4 }
  0x11   :  { %p683_p7 = pnand %p682_p6, %p676_p3 }
  0x13   :  { %686 = shalt.err (!%p683_p7)
}
  0x14   :  { %37 = dma.hbm_to_vmem [thread:$0]  %s1023_s1, 128, %s35_s28, [#allocation7]  }
  0x15   :  { %s687_s21 = scalar_lea.hbm %s1025_s3, 256 }
  0x16   :  { %p688_p8 = scmp.ne.s32.totalorder %s1025_s3, %s687_s21  ;;  %p691_p9 = scmp.lt.u32.totalorder %s687_s21, %s1025_s3 }
  0x18   :  { %p693_p10 = pnand %p691_p9, %p688_p8 }
  0x1a   :  { %696 = shalt.err (!%p693_p10)
}
  0x1b   :  { %s697_s26 = scalar_lea.vmem %s57_s30, 256  ;;  %p702_p12 = scmp.lt.s32.totalorder %s57_s30, %s57_s30 }
  0x1c   :  { %p698_p11 = scmp.ne.s32.totalorder %s57_s30, %s697_s26  ;;  %p703_p13 = scmp.lt.s32.totalorder %s697_s26, %s697_s26 }
  0x1e   :  { %p704_p0 = por %p703_p13, %p702_p12 }
  0x20   :  { %p705_p1 = pnand %p704_p0, %p698_p11 }
  0x22   :  { %708 = shalt.err (!%p705_p1)
}
  0x23   :  { %59 = dma.hbm_to_vmem [thread:$0]  %s1025_s3, 256, %s57_s30, [#allocation10]  }
  0x24   :  { %s831_s28 = smov [#allocation3]   ;;  %s832_s9 = smov [#allocation8]  }
  0x25   :  { %s24_s29 = sshll.u32 %s831_s28, 4  ;;  %s43_s10 = sshll.u32 %s832_s9, 4  ;;  %s25_s29 = int_to_ptr.vmem [resolvable:$true] %s24_s29  ;;  %s910_s10 = int_to_ptr.vmem [resolvable:$true] %s43_s10 }
  0x26   :  { %s709_s13 = scalar_lea.hbm %s1022_s0, 128 }
  0x27   :  { %p710_p2 = scmp.ne.s32.totalorder %s1022_s0, %s709_s13  ;;  %p713_p3 = scmp.lt.u32.totalorder %s709_s13, %s1022_s0 }
  0x29   :  { %p715_p4 = pnand %p713_p3, %p710_p2 }
  0x2b   :  { %718 = shalt.err (!%p715_p4)
}
  0x2c   :  { %s719_s3 = scalar_lea.vmem %s25_s29, 128  ;;  %p724_p6 = scmp.lt.s32.totalorder %s25_s29, %s25_s29 }
  0x2d   :  { %p720_p5 = scmp.ne.s32.totalorder %s25_s29, %s719_s3  ;;  %p725_p7 = scmp.lt.s32.totalorder %s719_s3, %s719_s3 }
  0x2f   :  { %p726_p8 = por %p725_p7, %p724_p6 }
  0x31   :  { %p727_p9 = pnand %p726_p8, %p720_p5 }
  0x33   :  { %730 = shalt.err (!%p727_p9)
}
  0x34   :  { %27 = dma.hbm_to_vmem [thread:$0]  %s1022_s0, 128, %s25_s29, [#allocation4]  }
  0x35   :  { %s731_s21 = scalar_lea.hbm %s1024_s2, 256 }
  0x36   :  { %p732_p10 = scmp.ne.s32.totalorder %s1024_s2, %s731_s21  ;;  %p735_p11 = scmp.lt.u32.totalorder %s731_s21, %s1024_s2 }
  0x38   :  { %p737_p12 = pnand %p735_p11, %p732_p10 }
  0x3a   :  { %740 = shalt.err (!%p737_p12)
}
  0x3b   :  { %s741_s26 = scalar_lea.vmem %s910_s10, 256  ;;  %p746_p0 = scmp.lt.s32.totalorder %s910_s10, %s910_s10 }
  0x3c   :  { %p742_p13 = scmp.ne.s32.totalorder %s910_s10, %s741_s26  ;;  %p747_p1 = scmp.lt.s32.totalorder %s741_s26, %s741_s26 }
  0x3e   :  { %p748_p2 = por %p747_p1, %p746_p0 }
  0x40   :  { %p749_p3 = pnand %p748_p2, %p742_p13 }
  0x42   :  { %752 = shalt.err (!%p749_p3)
}
  0x43   :  { %s833_s0 = smov 128   ;;  %s834_s1 = smov 8  }
  0x44   :  { %49 = dma.hbm_to_vmem [thread:$0]  %s1024_s2, 256, %s910_s10, [#allocation7], %s833_s0, %s833_s0, %s834_s1  }
  0x45   :  { %s835_s29 = smov [#allocation11]   ;;  %s836_s11 = smov [#allocation12]  }
  0x46   :  { %s65_s9 = sshll.u32 %s835_s29, 4  ;;  %s77_s12 = sshll.u32 %s836_s11, 4  ;;  %s66_s9 = int_to_ptr.vmem [resolvable:$true] %s65_s9  ;;  %s944_s12 = int_to_ptr.vmem [resolvable:$true] %s77_s12 }
  0x47   :  { %s753_s15 = scalar_lea.hbm %s1026_s4, 2048 }
  0x48   :  { %p754_p4 = scmp.ne.s32.totalorder %s1026_s4, %s753_s15  ;;  %p757_p5 = scmp.lt.u32.totalorder %s753_s15, %s1026_s4 }
  0x4a   :  { %p759_p6 = pnand %p757_p5, %p754_p4 }
  0x4c   :  { %762 = shalt.err (!%p759_p6)
}
  0x4d   :  { %s763_s2 = scalar_lea.vmem %s66_s9, 2048  ;;  %p768_p8 = scmp.lt.s32.totalorder %s66_s9, %s66_s9 }
  0x4e   :  { %p764_p7 = scmp.ne.s32.totalorder %s66_s9, %s763_s2  ;;  %p769_p9 = scmp.lt.s32.totalorder %s763_s2, %s763_s2 }
  0x50   :  { %p770_p10 = por %p769_p9, %p768_p8 }
  0x52   :  { %p771_p11 = pnand %p770_p10, %p764_p7 }
  0x54   :  { %774 = shalt.err (!%p771_p11)
}
  0x55   :  { %71 = dma.hbm_to_vmem [thread:$0]  %s1026_s4, 2048, %s66_s9, [#allocation10], %s833_s0, %s833_s0, %s834_s1  }
  0x56   :  { %s775_s21 = scalar_lea.hbm %s1027_s5, 2048 }
  0x57   :  { %p776_p12 = scmp.ne.s32.totalorder %s1027_s5, %s775_s21  ;;  %p779_p13 = scmp.lt.u32.totalorder %s775_s21, %s1027_s5 }
  0x59   :  { %p781_p0 = pnand %p779_p13, %p776_p12 }
  0x5b   :  { %784 = shalt.err (!%p781_p0)
}
  0x5c   :  { %s785_s26 = scalar_lea.vmem %s944_s12, 2048  ;;  %p790_p2 = scmp.lt.s32.totalorder %s944_s12, %s944_s12 }
  0x5d   :  { %p786_p1 = scmp.ne.s32.totalorder %s944_s12, %s785_s26  ;;  %p791_p3 = scmp.lt.s32.totalorder %s785_s26, %s785_s26 }
  0x5f   :  { %p792_p4 = por %p791_p3, %p790_p2 }
  0x61   :  { %p793_p5 = pnand %p792_p4, %p786_p1 }
  0x63   :  { %796 = shalt.err (!%p793_p5)
}
  0x64   :  { %83 = dma.hbm_to_vmem [thread:$0]  %s1027_s5, 2048, %s944_s12, [#allocation13], %s833_s0, %s833_s0, %s834_s1  }
  0x65   :  { %819 = dma.done.wait [#allocation4], 128  }
  0x66   :  { %820 = vsyncadd [#allocation4], 4294967168 }
  0x67   :  { %821 = dma.done.wait [#allocation7], 384  }
  0x68   :  { %822 = vsyncadd [#allocation7], 4294966912 }
  0x69   :  { %823 = dma.done.wait [#allocation10], 2304  }
  0x6a   :  { %824 = vsyncadd [#allocation10], 4294964992 }
  0x6b   :  { %825 = dma.done.wait [#allocation13], 2048  }
  0x6c   :  { %826 = vsyncadd [#allocation13], 4294965248  ;;  %v837_v0 = vmov 0.0|0.0   ;;  %v838_v1 = vmov 0.0   ;;  %vm839_vm0 = vmmov 0   ;;  %v112_v2 = vld [vmem:[#allocation9 + $0x8] sm:$0xff] }
  0x6d   :  { %602 = vmatprep.subr.bf16.mxu1 %v837_v0  ;;  %181 = vmatprep.mubr.f32.mxu0 %v838_v1  ;;  %v189_v3 = vld [vmem:[#allocation8] sm:$0xff]  ;;  %v190_v4 = vld [vmem:[#allocation8 + $0x8] sm:$0xff]  ;;  %vm113_vm1 = vcmask 64512   ;;  %v111_v6 = vld [vmem:[#allocation9] sm:$0xff]  ;;  %vm191_vm2 = vcmask 130048   ;;  %s840_s11 = smov [#allocation14]  }
  0x6e   :  { %529 = vmatprep.mubr.msk.f32.mxu1 %vm839_vm0, %v838_v1  ;;  %117 = vmatprep.subr.mxu0 %v112_v2  ;;  %v603_v5 = vpack.c.bf16 %v190_v4, %v189_v3  ;;  %v110_v7 = vld [vmem:[#allocation6] sm:$0xff]  ;;  %v274_v8 = vld [vmem:[#allocation11] sm:$0xff]  ;;  %v275_v9 = vld [vmem:[#allocation11 + $0x8] sm:$0xff]  ;;  %s471_s12 = sshll.u32 %s840_s11, 4  ;;  %s472_s12 = int_to_ptr.vmem [resolvable:$true] %s471_s12 }
  0x6f   :  { %118 = vmatpush1.msra.mxu0 %v111_v6  ;;  %v276_v10 = vld [vmem:[#allocation11 + $0x10] sm:$0xff]  ;;  %v606_v12 = vpack.c.bf16 %v275_v9, %v274_v8  ;;  %v277_v13 = vld [vmem:[#allocation11 + $0x18] sm:$0xff]  ;;  %v278_v15 = vld [vmem:[#allocation11 + $0x20] sm:$0xff]  ;;  %s797_s13 = scalar_lea.vmem %s472_s12, 128  ;;  %p802_p7 = scmp.lt.s32.totalorder %s472_s12, %s472_s12 }
  0x70   :  { %604 = vmatpush3.bf16.msra.mxu1 %v603_v5  ;;  %483 = vmatmul.mubr.msk.f32.vlgmr.msra.gmra.mrb[0].mxu0 %vm113_vm1, %v110_v7  ;;  %v188_v11 = vld [vmem:[#allocation3] sm:$0xff]  ;;  %v609_v14 = vpack.c.bf16 %v277_v13, %v276_v10  ;;  %v279_v16 = vld [vmem:[#allocation11 + $0x28] sm:$0xff]  ;;  %v281_v19 = vld [vmem:[#allocation11 + $0x38] sm:$0xff]  ;;  %p798_p6 = scmp.ne.s32.totalorder %s472_s12, %s797_s13  ;;  %p803_p8 = scmp.lt.s32.totalorder %s797_s13, %s797_s13 }
  0x71   :  { %605 = vmatprep.subr.bf16.mxu0 %v837_v0  ;;  %564 = vmatprep.mubr.msk.f32.mxu0 %vm839_vm0, %v838_v1  ;;  %v612_v17 = vpack.c.bf16 %v279_v16, %v278_v15  ;;  %v280_v18 = vld [vmem:[#allocation11 + $0x30] sm:$0xff]  ;;  %v282_v21 = vld [vmem:[#allocation11 + $0x40] sm:$0xff]  ;;  %v283_v22 = vld [vmem:[#allocation11 + $0x48] sm:$0xff] }
  0x72   :  { %607 = vmatpush3.bf16.msra.mxu0 %v606_v12  ;;  %629 = vmatprep.subr.bf16.mxu1 %v837_v0  ;;  %v615_v20 = vpack.c.bf16 %v281_v19, %v280_v18  ;;  %v618_v23 = vpack.c.bf16 %v283_v22, %v282_v21  ;;  %v284_v24 = vld [vmem:[#allocation11 + $0x50] sm:$0xff]  ;;  %v285_v25 = vld [vmem:[#allocation11 + $0x58] sm:$0xff]  ;;  %v286_v27 = vld [vmem:[#allocation11 + $0x60] sm:$0xff]  ;;  %p804_p9 = por %p803_p8, %p802_p7 }
  0x73   :  { %530 = vmatmul.mubr.msk.f32.vlgmr.msra.gmra.mrb[0].mxu1 %vm191_vm2, %v188_v11  ;;  %608 = vmatprep.subr.bf16.mxu0 %v837_v0  ;;  %v621_v26 = vpack.c.bf16 %v285_v25, %v284_v24  ;;  %v287_v28 = vld [vmem:[#allocation11 + $0x68] sm:$0xff]  ;;  %v288_v30 = vld [vmem:[#allocation11 + $0x70] sm:$0xff]  ;;  %v289_v31 = vld [vmem:[#allocation11 + $0x78] sm:$0xff] }
  0x74   :  { %599 = vmatprep.mubr.msk.f32.mxu1 %vm839_vm0, %v838_v1  ;;  %v624_v29 = vpack.c.bf16 %v287_v28, %v286_v27  ;;  %v627_v32 = vpack.c.bf16 %v289_v31, %v288_v30  ;;  %v371_v33 = vld [vmem:[#allocation12] sm:$0xff]  ;;  %v372_v34 = vld [vmem:[#allocation12 + $0x8] sm:$0xff]  ;;  %v373_v35 = vld [vmem:[#allocation12 + $0x10] sm:$0xff]  ;;  %p805_p10 = pnand %p804_p9, %p798_p6 }
  0x75   :  { %v630_v36 = vpack.c.bf16 %v372_v34, %v371_v33  ;;  %v374_v37 = vld [vmem:[#allocation12 + $0x18] sm:$0xff]  ;;  %v375_v39 = vld [vmem:[#allocation12 + $0x20] sm:$0xff]  ;;  %v376_v40 = vld [vmem:[#allocation12 + $0x28] sm:$0xff] }
  0x76   :  { %610 = vmatpush3.bf16.msra.mxu0 %v609_v14  ;;  %v633_v38 = vpack.c.bf16 %v374_v37, %v373_v35  ;;  %v636_v41 = vpack.c.bf16 %v376_v40, %v375_v39  ;;  %v377_v42 = vld [vmem:[#allocation12 + $0x30] sm:$0xff]  ;;  %v378_v43 = vld [vmem:[#allocation12 + $0x38] sm:$0xff]  ;;  %v379_v45 = vld [vmem:[#allocation12 + $0x40] sm:$0xff] }
  0x77   :  { %611 = vmatprep.subr.bf16.mxu0 %v837_v0  ;;  %631 = vmatpush3.bf16.msra.mxu1 %v630_v36  ;;  %v639_v44 = vpack.c.bf16 %v378_v43, %v377_v42  ;;  %v380_v46 = vld [vmem:[#allocation12 + $0x48] sm:$0xff]  ;;  %v381_v48 = vld [vmem:[#allocation12 + $0x50] sm:$0xff]  ;;  %v382_v49 = vld [vmem:[#allocation12 + $0x58] sm:$0xff] }
  0x78   :  { %632 = vmatprep.subr.bf16.mxu1 %v837_v0  ;;  %v642_v47 = vpack.c.bf16 %v380_v46, %v379_v45  ;;  %v645_v50 = vpack.c.bf16 %v382_v49, %v381_v48  ;;  %v485_v54 = vld [vmem:[%s1028_s6] ss:$0 sm:$0xff]  ;;  %v383_v60 = vld [vmem:[#allocation12 + $0x60] sm:$0xff]  ;;  %v384_v61 = vld [vmem:[#allocation12 + $0x68] sm:$0xff] }
  0x79   :  { %v648_v62 = vpack.c.bf16 %v384_v61, %v383_v60  ;;  %v385_v63 = vld [vmem:[#allocation12 + $0x70] sm:$0xff]  ;;  %v386_v1 = vld [vmem:[#allocation12 + $0x78] sm:$0xff] }
  0x7a   :  { %613 = vmatpush3.bf16.msra.mxu0 %v612_v17  ;;  %v651_v2 = vpack.c.bf16 %v386_v1, %v385_v63  ;;  %v486_v4 = vld [vmem:[%s1028_s6 + $0x1] ss:$0 sm:$0xff] }
  0x7b   :  { %614 = vmatprep.subr.bf16.mxu0 %v837_v0  ;;  %634 = vmatpush3.bf16.msra.mxu1 %v633_v38 }
  0x7c   :  { %635 = vmatprep.subr.bf16.mxu1 %v837_v0 }
  0x7e   :  { %616 = vmatpush3.bf16.msra.mxu0 %v615_v20 }
  0x7f   :  { %617 = vmatprep.subr.bf16.mxu0 %v837_v0  ;;  %637 = vmatpush3.bf16.msra.mxu1 %v636_v41 }
  0x80   :  { %638 = vmatprep.subr.bf16.mxu1 %v837_v0 }
  0x82   :  { %619 = vmatpush3.bf16.msra.mxu0 %v618_v23 }
  0x83   :  { %620 = vmatprep.subr.bf16.mxu0 %v837_v0  ;;  %640 = vmatpush3.bf16.msra.mxu1 %v639_v44 }
  0x84   :  { %641 = vmatprep.subr.bf16.mxu1 %v837_v0 }
  0x86   :  { %622 = vmatpush3.bf16.msra.mxu0 %v621_v26 }
  0x87   :  { %623 = vmatprep.subr.bf16.mxu0 %v837_v0  ;;  %643 = vmatpush3.bf16.msra.mxu1 %v642_v47 }
  0x88   :  { %644 = vmatprep.subr.bf16.mxu1 %v837_v0 }
  0x8a   :  { %625 = vmatpush3.bf16.msra.mxu0 %v624_v29 }
  0x8b   :  { %626 = vmatprep.subr.bf16.mxu0 %v837_v0  ;;  %646 = vmatpush3.bf16.msra.mxu1 %v645_v50 }
  0x8c   :  { %647 = vmatprep.subr.bf16.mxu1 %v837_v0 }
  0x8e   :  { %628 = vmatpush3.bf16.msra.mxu0 %v627_v32 }
  0x8f   :  { %649 = vmatpush3.bf16.msra.mxu1 %v648_v62 }
  0x90   :  { %650 = vmatprep.subr.bf16.mxu1 %v837_v0  ;;  %v487_v0 = vld [vmem:[%s1029_s7] ss:$0 sm:$0xff] }
  0x93   :  { %652 = vmatpush3.bf16.msra.mxu1 %v651_v2 }
 0x143   :  { %v183_v51 = vpop.f32.mrb[0].mxu0 }
 0x144   :  { %v185_v52 = vpop.f32.mrb[1].mxu0 }
 0x146   :  { %v261_v53 = vpop.f32.mrb[0].mxu1 }
 0x147   :  { %v262_v55 = vadd.f32 %v261_v53, %v183_v51  ;;  %v531_v56 = vpop.f32.mrb[1].mxu1 }
 0x149   :  { %v270_v57 = vadd.f32 %v485_v54, %v262_v55 }
 0x14b   :  { %v272_v58 = vmul.f32 0.2, %v270_v57  ;;  %vm271_vm3 = vcmp.gt.f32.partialorder %v270_v57, 0.0 }
 0x14d   :  { %v273_v59 = vsel %vm271_vm3, %v270_v57, %v272_v58 }
 0x14e   :  { %565 = vmatmul.mubr.f32.vlgmr.msra.gmra.mrb[2].mxu0 %v273_v59 }
 0x221   :  { %v356_v3 = vpop.f32.mrb[2].mxu0 }
 0x222   :  { %v357_v5 = vadd.f32 %v356_v3, %v185_v52  ;;  %v566_v6 = vpop.f32.mrb[3].mxu0 }
 0x224   :  { %v365_v7 = vadd.f32 %v486_v4, %v357_v5 }
 0x226   :  { %v367_v8 = vmul.f32 0.2, %v365_v7  ;;  %vm366_vm4 = vcmp.gt.f32.partialorder %v365_v7, 0.0 }
 0x228   :  { %v368_v9 = vsel %vm366_vm4, %v365_v7, %v367_v8 }
 0x229   :  { %600 = vmatmul.mubr.f32.vlgmr.msra.gmra.mrb[2].mxu1 %v368_v9 }
 0x2fc   :  { %v460_v10 = vpop.f32.mrb[2].mxu1 }
 0x2fd   :  { %v461_v11 = vadd.f32 %v487_v0, %v460_v10  ;;  %v601_v12 = vpop.f32.mrb[3].mxu1 }
 0x2ff   :  { %464 = vst [vmem:[#allocation14] sm:$0xff] %v461_v11 }
 0x300   :  { %808 = shalt.err (!%p805_p10)
}
 0x301   :  { %s809_s15 = scalar_lea.hbm %s1030_s8, 128 }
 0x302   :  { %p810_p11 = scmp.ne.s32.totalorder %s1030_s8, %s809_s15  ;;  %p813_p12 = scmp.lt.u32.totalorder %s809_s15, %s1030_s8 }
 0x304   :  { %p815_p13 = pnand %p813_p12, %p810_p11 }
 0x306   :  { %818 = shalt.err (!%p815_p13)
}
 0x307   :  { %474 = dma.vmem_to_hbm [thread:$0]  %s472_s12, 128, %s1030_s8, [#allocation5]  }
 0x308   :  { %827 = dma.done.wait [#allocation5], 128  }
 0x309   :  { %828 = vsyncadd [#allocation5], 4294967168 }
 0x30a   :  { %478 = vsyncpa [#allocation4], 1 }
 0x30b   :  { %479 = vsyncpa [#allocation7], 1 }
 0x30c   :  { %480 = vsyncpa [#allocation10], 1 }
 0x30d   :  { %481 = vsyncpa [#allocation13], 1 }
 0x30e   :  { %482 = vsyncpa [#allocation5], 1 }

</bundles_post_ra>
